<compile_context>
chip_gen: v7x
topology: tpu7x:2x2x1
jax: 0.10.0
libtpu: 0.0.40
codegen_flags: <defaults>
</compile_context>

<pallas_src>
import functools

import jax
import jax.numpy as jnp
from jax.experimental import pallas as pl
from jax.experimental.pallas import tpu as pltpu


def _round_up(x, m):
    return ((x + m - 1) // m) * m


# ---------------------------------------------------------------------------
# Kernels
# ---------------------------------------------------------------------------
def _vae_loss_kernel(ec_ref, rec_ref, prob_ref, out_ref, sq_acc, kl_acc, *,
                     nll_scale, kl_scale, eps):
    """Streaming kernel. grid = (num_core_partials, time_chunks_per_core)."""
    t = pl.program_id(1)

    @pl.when(t == 0)
    def _():
        sq_acc[...] = jnp.zeros_like(sq_acc)
        kl_acc[...] = jnp.zeros_like(kl_acc)

    # Pure elementwise VPU work per step + a cheap sublane-group partial
    # reduction (vreg adds along the leading, untiled axis) into tiny
    # accumulators.  All cross-lane work happens once, in the epilogue.
    diff = rec_ref[...] - ec_ref[...]
    d2 = diff * diff
    tt, nd = d2.shape
    sq_acc[...] += jnp.sum(d2.reshape(tt // 8, 8, nd), axis=0)

    p = prob_ref[...]
    plp = p * jnp.log(p + jnp.float32(eps))
    _, mk = plp.shape
    kl_acc[...] += jnp.sum(plp.reshape(tt // 8, 8, mk), axis=0)

    @pl.when(t == pl.num_programs(1) - 1)
    def _():
        # Single XLU reduction + constant scaling per core-partial.
        partial = (jnp.float32(nll_scale) * jnp.sum(sq_acc[...])
                   + jnp.float32(kl_scale) * jnp.sum(kl_acc[...]))
        out_ref[...] = jnp.broadcast_to(partial, out_ref.shape)


def _vae_loss_kernel_single(ec_ref, rec_ref, prob_ref, out_ref, *,
                            nll_scale, kl_scale, eps):
    """Fast path when everything fits in one block: no scratch, no pl.when."""
    diff = rec_ref[...] - ec_ref[...]
    p = prob_ref[...]
    total = (jnp.float32(nll_scale) * jnp.sum(diff * diff)
             + jnp.float32(kl_scale) * jnp.sum(p * jnp.log(p + jnp.float32(eps))))
    out_ref[...] = jnp.broadcast_to(total, out_ref.shape)


# ---------------------------------------------------------------------------
# Tiling plan
# ---------------------------------------------------------------------------
def _vmem_budget_bytes():
    """Generation-aware live-input budget for the double-buffered pipeline."""
    try:
        cap = pltpu.get_tpu_info().vmem_capacity_bytes
    except Exception:
        cap = 64 << 20          # assume v7x per-TC VMEM (most restrictive)
    return min(24 << 20, cap // 4)


def _pick_time_block(T, nd_pad, mk_pad, budget_bytes):
    row_bytes = 4 * (2 * nd_pad + mk_pad)          # one timestep of f32 inputs
    tt = (budget_bytes // (2 * row_bytes)) // 8 * 8  # 2x for double buffering
    tt = max(8, min(1024, tt))                      # 512-1024 rows ~ HBM roofline
    return min(tt, _round_up(T, 8))
    # TODO(synk): if a single 8-row slab exceeds the budget (huge N*D), the
    #             feature dimension would also need tiling.


# ---------------------------------------------------------------------------
# Wrapper
# ---------------------------------------------------------------------------
def vae_loss(ec, rec, z_prob, *, concept_num, edge_type_num=2, var=5e-05,
             eps=1e-16, time_block=None):
    T, N, D = ec.shape
    _, M, K = z_prob.shape
    ND, MK = N * D, M * K
    ND_pad = _round_up(ND, 128)
    MK_pad = _round_up(MK, 128)

    # Fold all loop-invariant scales into two constants applied once:
    #   loss = sum_sq/(2*var*N*D*T) + sum_p_logp/(concept_num*M*T)
    nll_scale = 1.0 / (2.0 * float(var) * ND * T)
    kl_scale = 1.0 / (float(concept_num) * M * T)

    tt = (time_block if time_block is not None
          else _pick_time_block(T, ND_pad, MK_pad, _vmem_budget_bytes()))
    assert tt > 0 and tt % 8 == 0

    T8 = _round_up(T, 8)
    n_chunks = -(-T8 // tt)
    # Per-core partial sums (v7x megacore); extra grid axis is harmless on
    # 1-TC v5e/v6e.
    NC = 2 if n_chunks >= 2 else 1
    cpc = -(-n_chunks // NC)                 # time chunks per core
    T_pad = NC * cpc * tt

    # Wrapper-side layout plumbing: lane-dense 2D slabs, explicit zero padding.
    # Zero rows/lanes contribute exactly 0 to both sums (diff=0, 0*log(eps)=0).
    ec2 = jnp.pad(ec.reshape(T, ND).astype(jnp.float32),
                  ((0, T_pad - T), (0, ND_pad - ND)))
    rec2 = jnp.pad(rec.reshape(T, ND).astype(jnp.float32),
                   ((0, T_pad - T), (0, ND_pad - ND)))
    prob2 = jnp.pad(z_prob.reshape(T, MK).astype(jnp.float32),
                    ((0, T_pad - T), (0, MK_pad - MK)))

    cost = pl.CostEstimate(
        flops=3 * T * ND + 3 * T * MK,
        transcendentals=T * MK,
        bytes_accessed=4 * (T_pad * (2 * ND_pad + MK_pad) + NC * 8 * 128))

    if NC == 1 and cpc == 1:
        # Everything fits in one block: skip scratch / init / epilogue gating.
        kern = functools.partial(_vae_loss_kernel_single, nll_scale=nll_scale,
                                 kl_scale=kl_scale, eps=eps)
        out = pl.pallas_call(
            kern,
            out_shape=jax.ShapeDtypeStruct((8, 128), jnp.float32),
            grid_spec=pltpu.PrefetchScalarGridSpec(
                num_scalar_prefetch=0,
                grid=(1,),
                in_specs=[
                    pl.BlockSpec((tt, ND_pad), lambda i: (0, 0)),
                    pl.BlockSpec((tt, ND_pad), lambda i: (0, 0)),
                    pl.BlockSpec((tt, MK_pad), lambda i: (0, 0)),
                ],
                out_specs=pl.BlockSpec((8, 128), lambda i: (0, 0)),
            ),
            compiler_params=pltpu.CompilerParams(
                dimension_semantics=("arbitrary",),
                vmem_limit_bytes=48 << 20),
            cost_estimate=cost,
        )(ec2, rec2, prob2)
        return out[0, 0]

    kern = functools.partial(_vae_loss_kernel, nll_scale=nll_scale,
                             kl_scale=kl_scale, eps=eps)
    out = pl.pallas_call(
        kern,
        out_shape=jax.ShapeDtypeStruct((NC * 8, 128), jnp.float32),
        grid_spec=pltpu.PrefetchScalarGridSpec(
            num_scalar_prefetch=0,
            grid=(NC, cpc),
            in_specs=[
                pl.BlockSpec((tt, ND_pad), lambda c, t: (c * cpc + t, 0)),
                pl.BlockSpec((tt, ND_pad), lambda c, t: (c * cpc + t, 0)),
                pl.BlockSpec((tt, MK_pad), lambda c, t: (c * cpc + t, 0)),
            ],
            out_specs=pl.BlockSpec((8, 128), lambda c, t: (c, 0)),
            scratch_shapes=[
                pltpu.VMEM((8, ND_pad), jnp.float32),   # running sublane-group sum of diff^2
                pltpu.VMEM((8, MK_pad), jnp.float32),   # running sublane-group sum of p*log(p+eps)
            ],
        ),
        compiler_params=pltpu.CompilerParams(
            dimension_semantics=("parallel", "arbitrary"),
            vmem_limit_bytes=48 << 20),
        cost_estimate=cost,
    )(ec2, rec2, prob2)
    # Combine per-core partial sums (element [0, 0] of each core's block).
    return jnp.sum(out[::8, 0])


# ---------------------------------------------------------------------------
# Pure-JAX reference mirroring the PyTorch module
# ---------------------------------------------------------------------------
def vae_loss_ref(ec, rec, z_prob, *, concept_num, edge_type_num=2, var=5e-05,
                 eps=1e-16):
    T = ec.shape[0]
    loss = 0.0
    for t in range(T):
        output, target, prob = rec[t], ec[t], z_prob[t]
        loss_nll = jnp.mean((output - target) ** 2 / (2 * var))
        loss_kl = jnp.sum(prob * jnp.log(prob + eps)) / (concept_num * prob.shape[0])
        loss = loss + loss_nll + loss_kl
    return loss / T


if __name__ == "__main__":
    concept_num, var = 16, 5e-05

    def make_case(key, T, N, D, M, K):
        k1, k2, k3 = jax.random.split(key, 3)
        ec = jax.random.normal(k1, (T, N, D), dtype=jnp.float32)
        rec = ec + 0.01 * jax.random.normal(k2, (T, N, D), dtype=jnp.float32)
        z_prob = jax.nn.softmax(
            jax.random.normal(k3, (T, M, K), dtype=jnp.float32), axis=-1)
        return ec, rec, z_prob

    key = jax.random.PRNGKey(0)
    k1, k2 = jax.random.split(key)

    # Case 1: small shapes (exercises the single-block fast path).
    ec, rec, z_prob = make_case(k1, T=4, N=8, D=32, M=8, K=2)
    out = vae_loss(ec, rec, z_prob, concept_num=concept_num,
                   edge_type_num=2, var=var)
    out = jax.block_until_ready(out)
    ref = vae_loss_ref(ec, rec, z_prob, concept_num=concept_num,
                       edge_type_num=2, var=var)
    assert jnp.allclose(out, ref, rtol=1e-4, atol=1e-5), (out, ref)

    # Case 2: forces the streaming grid (2 core-partials x 2 time chunks).
    ec, rec, z_prob = make_case(k2, T=32, N=8, D=32, M=8, K=2)
    out = vae_loss(ec, rec, z_prob, concept_num=concept_num,
                   edge_type_num=2, var=var, time_block=8)
    out = jax.block_until_ready(out)
    ref = vae_loss_ref(ec, rec, z_prob, concept_num=concept_num,
                       edge_type_num=2, var=var)
    assert jnp.allclose(out, ref, rtol=1e-4, atol=1e-5), (out, ref)

    print("KERNEL_OK")
</pallas_src>

<mosaic_0001>
module attributes {stable_mosaic.version = 11 : i64} {
  func.func @_vae_loss_kernel_single(%arg0: i32, %arg1: memref<8x256xf32, #tpu.memory_space<vmem>>, %arg2: memref<8x256xf32, #tpu.memory_space<vmem>>, %arg3: memref<8x128xf32, #tpu.memory_space<vmem>>, %arg4: memref<8x128xf32, #tpu.memory_space<vmem>>) attributes {dimension_semantics = [#tpu.dimension_semantics<arbitrary>], iteration_bounds = array<i64: 1>, scalar_prefetch = 0 : i64, scratch_operands = 0 : i64, tpu.core_type = #tpu.core_type<tc>, window_params = [{pipeline_mode = #tpu.pipeline_mode<synchronous>, transform_indices = @transform_0, window_bounds = array<i64: 8, 256>}, {pipeline_mode = #tpu.pipeline_mode<synchronous>, transform_indices = @transform_1, window_bounds = array<i64: 8, 256>}, {pipeline_mode = #tpu.pipeline_mode<synchronous>, transform_indices = @transform_2, window_bounds = array<i64: 8, 128>}, {pipeline_mode = #tpu.pipeline_mode<synchronous>, transform_indices = @transform_3, window_bounds = array<i64: 8, 128>}]} {
    %c0 = arith.constant 0 : index
    %c0_0 = arith.constant 0 : index
    %0 = vector.load %arg2[%c0, %c0_0] : memref<8x256xf32, #tpu.memory_space<vmem>>, vector<8x256xf32>
    %c0_1 = arith.constant 0 : index
    %c0_2 = arith.constant 0 : index
    %1 = vector.load %arg1[%c0_1, %c0_2] : memref<8x256xf32, #tpu.memory_space<vmem>>, vector<8x256xf32>
    %2 = arith.subf %0, %1 : vector<8x256xf32>
    %c0_3 = arith.constant 0 : index
    %c0_4 = arith.constant 0 : index
    %3 = vector.load %arg3[%c0_3, %c0_4] : memref<8x128xf32, #tpu.memory_space<vmem>>, vector<8x128xf32>
    %4 = arith.mulf %2, %2 : vector<8x256xf32>
    %5 = vector.shape_cast %4 : vector<8x256xf32> to vector<1x8x256xf32>
    %cst = arith.constant dense<0.000000e+00> : vector<1xf32>
    %6 = vector.multi_reduction <add>, %5, %cst [1, 2] : vector<1x8x256xf32> to vector<1xf32>
    %7 = vector.shape_cast %6 : vector<1xf32> to vector<1x1x1xf32>
    %8 = vector.extract %7[0, 0, 0] : f32 from vector<1x1x1xf32>
    %cst_5 = arith.constant 9.765625 : f32
    %9 = arith.mulf %cst_5, %8 : f32
    %cst_6 = arith.constant 1.000000e-16 : f32
    %10 = vector.broadcast %cst_6 : f32 to vector<8x128xf32>
    %11 = arith.addf %3, %10 : vector<8x128xf32>
    %12 = math.log %11 : vector<8x128xf32>
    %13 = arith.mulf %3, %12 : vector<8x128xf32>
    %14 = vector.shape_cast %13 : vector<8x128xf32> to vector<1x8x128xf32>
    %cst_7 = arith.constant dense<0.000000e+00> : vector<1xf32>
    %15 = vector.multi_reduction <add>, %14, %cst_7 [1, 2] : vector<1x8x128xf32> to vector<1xf32>
    %16 = vector.shape_cast %15 : vector<1xf32> to vector<1x1x1xf32>
    %17 = vector.extract %16[0, 0, 0] : f32 from vector<1x1x1xf32>
    %cst_8 = arith.constant 0.001953125 : f32
    %18 = arith.mulf %cst_8, %17 : f32
    %19 = arith.addf %9, %18 : f32
    %20 = vector.broadcast %19 : f32 to vector<8x128xf32>
    %c0_9 = arith.constant 0 : index
    %c0_10 = arith.constant 0 : index
    %21 = vector.load %arg4[%c0_9, %c0_10] : memref<8x128xf32, #tpu.memory_space<vmem>>, vector<8x128xf32>
    tpu.vector_store %arg4[%c0_9, %c0_10], %20 {strides = array<i32>} : memref<8x128xf32, #tpu.memory_space<vmem>>, vector<8x128xf32>,
    return
  }
  func.func @transform_0(%arg0: i32) -> (i32, i32) {
    %c0_i32 = arith.constant 0 : i32
    %c0_i32_0 = arith.constant 0 : i32
    %c0_i32_1 = arith.constant 0 : i32
    return %c0_i32, %c0_i32_0 : i32, i32
  }
  func.func @transform_1(%arg0: i32) -> (i32, i32) {
    %c0_i32 = arith.constant 0 : i32
    %c0_i32_0 = arith.constant 0 : i32
    %c0_i32_1 = arith.constant 0 : i32
    return %c0_i32, %c0_i32_0 : i32, i32
  }
  func.func @transform_2(%arg0: i32) -> (i32, i32) {
    %c0_i32 = arith.constant 0 : i32
    %c0_i32_0 = arith.constant 0 : i32
    %c0_i32_1 = arith.constant 0 : i32
    return %c0_i32, %c0_i32_0 : i32, i32
  }
  func.func @transform_3(%arg0: i32) -> (i32, i32) {
    %c0_i32 = arith.constant 0 : i32
    %c0_i32_0 = arith.constant 0 : i32
    %c0_i32_1 = arith.constant 0 : i32
    return %c0_i32, %c0_i32_0 : i32, i32
  }
}

</mosaic_0001>

<bundles_post_ra>
// kernel: tpu_custom_call.1
= control target key start
LH: loop header
LB: loop body
LE: loop exit
PB: predicated region body
PF: predicated region fallthrough
CT: control target
= control target key end

     0   :  { %8 = vsyncpa [#allocation3], 0  ;;  %s279_s0 = inlined_call_operand.hbm [shape: f32[8,256], index: 0, kind: input, shape index: {}]   ;;  %s280_s1 = inlined_call_operand.hbm [shape: f32[8,256], index: 1, kind: input, shape index: {}]   ;;  %s281_s2 = inlined_call_operand.hbm [shape: f32[8,128], index: 2, kind: input, shape index: {}]   ;;  %s282_s3 = inlined_call_operand.hbm [shape: f32[8,128], index: 3, kind: output, shape index: {}]  }
   0x1   :  { %9 = vsyncpa [#allocation6], 0 }
   0x2   :  { %10 = vsyncpa [#allocation4], 0  ;;  %s207_s12 = smov [#allocation5]   ;;  %s208_s14 = smov [#allocation2]  }
   0x3   :  { %s27_s13 = sshll.u32 %s207_s12, 4  ;;  %s17_s15 = sshll.u32 %s208_s14, 4  ;;  %s28_s13 = int_to_ptr.vmem [resolvable:$true] %s27_s13  ;;  %s18_s15 = int_to_ptr.vmem [resolvable:$true] %s17_s15 }
   0x4   :  { %s113_s18 = scalar_lea.hbm %s280_s1, 256 }
   0x5   :  { %p114_p0 = scmp.ne.s32.totalorder %s280_s1, %s113_s18  ;;  %p117_p1 = scmp.lt.u32.totalorder %s113_s18, %s280_s1 }
   0x7   :  { %p119_p2 = pnand %p117_p1, %p114_p0 }
   0x9   :  { %122 = shalt.err (!%p119_p2)
}
   0xa   :  { %s123_s23 = scalar_lea.vmem %s28_s13, 256  ;;  %p128_p4 = scmp.lt.s32.totalorder %s28_s13, %s28_s13 }
   0xb   :  { %p124_p3 = scmp.ne.s32.totalorder %s28_s13, %s123_s23  ;;  %p129_p5 = scmp.lt.s32.totalorder %s123_s23, %s123_s23 }
   0xd   :  { %p130_p6 = por %p129_p5, %p128_p4 }
   0xf   :  { %p131_p7 = pnand %p130_p6, %p124_p3 }
  0x11   :  { %134 = shalt.err (!%p131_p7)
}
  0x12   :  { %30 = dma.hbm_to_vmem [thread:$0]  %s280_s1, 256, %s28_s13, [#allocation6]  }
  0x13   :  { %s135_s28 = scalar_lea.hbm %s279_s0, 256 }
  0x14   :  { %p136_p8 = scmp.ne.s32.totalorder %s279_s0, %s135_s28  ;;  %p139_p9 = scmp.lt.u32.totalorder %s135_s28, %s279_s0 }
  0x16   :  { %p141_p10 = pnand %p139_p9, %p136_p8 }
  0x18   :  { %144 = shalt.err (!%p141_p10)
}
  0x19   :  { %s145_s6 = scalar_lea.vmem %s18_s15, 256  ;;  %p150_p12 = scmp.lt.s32.totalorder %s18_s15, %s18_s15 }
  0x1a   :  { %p146_p11 = scmp.ne.s32.totalorder %s18_s15, %s145_s6  ;;  %p151_p13 = scmp.lt.s32.totalorder %s145_s6, %s145_s6 }
  0x1c   :  { %p152_p0 = por %p151_p13, %p150_p12 }
  0x1e   :  { %p153_p1 = pnand %p152_p0, %p146_p11 }
  0x20   :  { %156 = shalt.err (!%p153_p1)
}
  0x21   :  { %20 = dma.hbm_to_vmem [thread:$0]  %s279_s0, 256, %s18_s15, [#allocation3]  }
  0x22   :  { %s209_s8 = smov [#allocation7]   ;;  %s157_s12 = scalar_lea.hbm %s281_s2, 128 }
  0x23   :  { %s37_s9 = sshll.u32 %s209_s8, 4  ;;  %p158_p2 = scmp.ne.s32.totalorder %s281_s2, %s157_s12  ;;  %s38_s9 = int_to_ptr.vmem [resolvable:$true] %s37_s9 }
  0x24   :  { %p161_p3 = scmp.lt.u32.totalorder %s157_s12, %s281_s2 }
  0x26   :  { %p163_p4 = pnand %p161_p3, %p158_p2 }
  0x28   :  { %166 = shalt.err (!%p163_p4)
}
  0x29   :  { %s167_s18 = scalar_lea.vmem %s38_s9, 128  ;;  %p172_p6 = scmp.lt.s32.totalorder %s38_s9, %s38_s9 }
  0x2a   :  { %p168_p5 = scmp.ne.s32.totalorder %s38_s9, %s167_s18  ;;  %p173_p7 = scmp.lt.s32.totalorder %s167_s18, %s167_s18 }
  0x2c   :  { %p174_p8 = por %p173_p7, %p172_p6 }
  0x2e   :  { %p175_p9 = pnand %p174_p8, %p168_p5 }
  0x30   :  { %178 = shalt.err (!%p175_p9)
}
  0x31   :  { %40 = dma.hbm_to_vmem [thread:$0]  %s281_s2, 128, %s38_s9, [#allocation6]  }
  0x32   :  { %201 = dma.done.wait [#allocation3], 256  }
  0x33   :  { %202 = vsyncadd [#allocation3], 4294967040 }
  0x34   :  { %203 = dma.done.wait [#allocation6], 384  }
  0x35   :  { %204 = vsyncadd [#allocation6], 4294966912  ;;  %v50_v0 = vld [vmem:[#allocation5] sm:$0xff]  ;;  %v51_v1 = vld [vmem:[#allocation5 + $0x8] sm:$0xff]  ;;  %s210_s22 = smov [#allocation8]  }
  0x36   :  { %v52_v2 = vld [vmem:[#allocation2] sm:$0xff]  ;;  %v53_v3 = vld [vmem:[#allocation2 + $0x8] sm:$0xff]  ;;  %s93_s23 = sshll.u32 %s210_s22, 4  ;;  %s94_s23 = int_to_ptr.vmem [resolvable:$true] %s93_s23 }
  0x37   :  { %v54_v4 = vsub.f32 %v50_v0, %v52_v2  ;;  %v56_v5 = vld [vmem:[#allocation7] sm:$0xff]  ;;  %v55_v6 = vsub.f32 %v51_v1, %v53_v3  ;;  %s179_s25 = scalar_lea.vmem %s94_s23, 128  ;;  %p184_p11 = scmp.lt.s32.totalorder %s94_s23, %s94_s23 }
  0x38   :  { %v70_v7 = vadd.f32 1e-16, %v56_v5  ;;  %p180_p10 = scmp.ne.s32.totalorder %s94_s23, %s179_s25  ;;  %p185_p12 = scmp.lt.s32.totalorder %s179_s25, %s179_s25 }
  0x39   :  { %v57_v8 = vmul.f32 %v54_v4, %v54_v4  ;;  %v58_v9 = vmul.f32 %v55_v6, %v55_v6 }
  0x3a   :  { %111 = vlog2.f32 %v70_v7  ;;  %p186_p13 = por %p185_p12, %p184_p11 }
  0x3b   :  { %v59_v10 = vadd.f32 %v58_v9, %v57_v8 }
  0x3c   :  { %p187_p0 = pnand %p186_p13, %p180_p10 }
  0x3d   :  { %60 = vadd.xlane.f32.xlu0 %v59_v10 }
  0x44   :  { %v112_v11 = vpop.eup %111 }
  0x45   :  { %v72_v12 = vmul.f32 0.6931472, %v112_v11 }
  0x47   :  { %v73_v13 = vmul.f32 %v72_v12, %v56_v5 }
  0x49   :  { %74 = vadd.xlane.f32.xlu0 %v73_v13 }
  0xca   :  { %v61_v14 = vpop.xlane.xlu0 %60 }
  0xcb   :  { %v62_v15 = vrot.slane %v61_v14, 4 }
  0xcd   :  { %v63_v16 = vadd.f32 %v62_v15, %v61_v14 }
  0xcf   :  { %v64_v17 = vrot.slane %v63_v16, 2 }
  0xd1   :  { %v65_v18 = vadd.f32 %v64_v17, %v63_v16 }
  0xd3   :  { %v66_v19 = vrot.slane %v65_v18, 1 }
  0xd5   :  { %v67_v21 = vadd.f32 %v66_v19, %v65_v18 }
  0xd6   :  { %v75_v20 = vpop.xlane.xlu0 %74 }
  0xd7   :  { %v76_v22 = vrot.slane %v75_v20, 4  ;;  %103 = vpush %v67_v21 }
  0xd9   :  { %v77_v23 = vadd.f32 %v76_v22, %v75_v20 }
  0xdb   :  { %v78_v24 = vrot.slane %v77_v23, 2 }
  0xdd   :  { %v79_v25 = vadd.f32 %v78_v24, %v77_v23 }
  0xdf   :  { %v80_v26 = vrot.slane %v79_v25, 1 }
  0xe1   :  { %v81_v27 = vadd.f32 %v80_v26, %v79_v25 }
  0xe3   :  { %105 = vpush %v81_v27 }
 0x108   :  { %s104_s2 = spop %103 }
 0x109   :  { %s69_s19 = smul.f32 9.765625, %s104_s2 }
 0x114   :  { %s106_s20 = spop %105 }
 0x115   :  { %s83_s21 = smul.f32 0.001953125, %s106_s20 }
 0x117   :  { %s84_s24 = sadd.f32 %s83_s21, %s69_s19 }
 0x119   :  { %v85_v28 = vstv %s84_s24 }
 0x11a   :  { %86 = vst [vmem:[#allocation8] sm:$0xff] %v85_v28 }
 0x11b   :  { %190 = shalt.err (!%p187_p0)
}
 0x11c   :  { %s191_s28 = scalar_lea.hbm %s282_s3, 128 }
 0x11d   :  { %p192_p1 = scmp.ne.s32.totalorder %s282_s3, %s191_s28  ;;  %p195_p2 = scmp.lt.u32.totalorder %s191_s28, %s282_s3 }
 0x11f   :  { %p197_p3 = pnand %p195_p2, %p192_p1 }
 0x121   :  { %200 = shalt.err (!%p197_p3)
}
 0x122   :  { %96 = dma.vmem_to_hbm [thread:$0]  %s94_s23, 128, %s282_s3, [#allocation4]  }
 0x123   :  { %205 = dma.done.wait [#allocation4], 128  }
 0x124   :  { %206 = vsyncadd [#allocation4], 4294967168 }
 0x125   :  { %100 = vsyncpa [#allocation3], 1 }
 0x126   :  { %101 = vsyncpa [#allocation6], 1 }
 0x127   :  { %102 = vsyncpa [#allocation4], 1 }

</bundles_post_ra>
